<compile_context>
chip_gen: v5e
topology: v5e:2x2
jax: 0.10.0
libtpu: 0.0.40
codegen_flags: <defaults>
</compile_context>

<pallas_src>
import jax
import jax.numpy as jnp
from jax.experimental import pallas as pl
from jax.experimental.pallas import tpu as pltpu


def _conv1x1_kernel(x_ref, w_ref, o_ref):
    # x_ref: (1, C_in, T)   lane-dense activation tile
    # w_ref: (C_out, C_in)  resident weight (constant index map)
    # o_ref: (1, C_out, T)  lane-dense output tile
    # MXU dot with f32 accumulation: avoids a full-size (C_in, T) f32 upcast
    # temp in VMEM and keeps VALU slots free (the kernel is HBM-bound anyway).
    acc = jnp.dot(w_ref[...], x_ref[0], preferred_element_type=jnp.float32)
    o_ref[0] = acc.astype(o_ref.dtype)


def _round_down_128(v):
    return max(128, (v // 128) * 128)


def _pick_tile_hw(hw, c_in, itemsize, n, *, per_buffer_bytes=4 << 20, min_steps=8):
    """Pick the lane (spatial) tile size T such that:

      * T is a multiple of 128 (or the full extent when HW <= 128) -> legal BlockSpec
      * the input tile (C_in * T * itemsize) stays <= per_buffer_bytes so the
        double-buffered pipeline fits every generation's scoped-VMEM default
        (v5e 16 MiB, v6e 32 MiB, v7x 32 MiB scoped / 64 MiB physical)
      * DMA rows stay long (T * itemsize >= ~2 KiB) for HBM efficiency
      * the grid has enough steps (N * cdiv(HW, T)) to pipeline and to shard
        across both v7x TensorCores even for small N.
    """
    if hw <= 128:
        return hw                                          # full extent is the only legal block

    lane_floor = _round_down_128(-(-2048 // itemsize))     # 512 lanes f32 / 1024 bf16
    cap = _round_down_128(per_buffer_bytes // (itemsize * max(c_in, 1)))
    hw_padded = -(-hw // 128) * 128

    t = min(cap, hw_padded)

    # soft: aim for >= min_steps total grid steps without dropping below the
    # DMA row-length floor (pipelining / megacore sharding)
    steps_per_batch = -(-min_steps // max(n, 1))
    if steps_per_batch > 1:
        t_soft = _round_down_128(-(-hw // steps_per_batch))
        t = min(t, max(t_soft, lane_floor))

    # hard: guarantee >= 2 total steps so DMA/compute overlap and both v7x
    # TensorCores get work even when N == 1 and HW would fit one tile
    if n * (-(-hw // t)) < 2:
        t = min(t, _round_down_128(-(-hw // 2)))

    return max(t, 128)


def netlin_layer_forward(x_nchw, weight):
    """NetLinLayer forward: 1x1 conv, no bias.

    x_nchw : (N, C_in, H, W)
    weight : (C_out, C_in, 1, 1)   (PyTorch Conv2d weight layout)
    returns: (N, C_out, H, W)
    """
    # TODO(synk): nn.Dropout (use_dropout=True, training mode) not implemented;
    #             default use_dropout=False / eval-mode dropout is identity.
    N, C_in, H, W = x_nchw.shape
    C_out = weight.shape[0]
    HW = H * W

    x3 = x_nchw.reshape(N, C_in, HW)                  # pure view, no HBM transpose pass
    # lane-dense (C_out, C_in) weight in the activation dtype: the only upcast
    # happens inside the MXU's f32 accumulator.
    w_mat = weight.reshape(C_out, C_in).astype(x_nchw.dtype)

    itemsize = jnp.dtype(x_nchw.dtype).itemsize
    tile_hw = _pick_tile_hw(HW, C_in, itemsize, N)
    grid = (N, pl.cdiv(HW, tile_hw))                  # partial last block: OOB output
                                                      # lanes are masked on store and the
                                                      # reduction is only over C_in, so
                                                      # padded garbage never reaches them

    # explicit VMEM budget: double-buffered in/out tiles + resident weight,
    # with generous headroom; safe on every generation (well under 64 MiB).
    in_tile_bytes = C_in * tile_hw * itemsize
    out_tile_bytes = C_out * tile_hw * itemsize
    w_tile_bytes = max(C_out, 8) * max(C_in, 128) * itemsize
    footprint = 2 * (in_tile_bytes + out_tile_bytes + w_tile_bytes)
    vmem_limit = int(min(48 << 20, max(2 * footprint, 8 << 20)))

    cost = pl.CostEstimate(
        flops=2 * N * C_in * C_out * HW,
        transcendentals=0,
        bytes_accessed=(N * C_in * HW + N * C_out * HW + C_in * C_out) * itemsize,
    )

    out3 = pl.pallas_call(
        _conv1x1_kernel,
        out_shape=jax.ShapeDtypeStruct((N, C_out, HW), x_nchw.dtype),
        grid_spec=pltpu.PrefetchScalarGridSpec(
            num_scalar_prefetch=0,
            grid=grid,
            in_specs=[
                pl.BlockSpec((1, C_in, tile_hw), lambda n, j: (n, 0, j)),
                pl.BlockSpec((C_out, C_in), lambda n, j: (0, 0)),
            ],
            out_specs=pl.BlockSpec((1, C_out, tile_hw), lambda n, j: (n, 0, j)),
        ),
        compiler_params=pltpu.CompilerParams(
            dimension_semantics=("parallel", "parallel"),
            vmem_limit_bytes=vmem_limit,
        ),
        cost_estimate=cost,
    )(x3, w_mat)

    return out3.reshape(N, C_out, H, W)


if __name__ == "__main__":
    key = jax.random.PRNGKey(0)
    kx, kw = jax.random.split(key)

    N, C_in, H, W = 2, 4, 16, 16
    C_out = 1  # NetLinLayer default chn_out=1

    x = jax.random.normal(kx, (N, C_in, H, W), dtype=jnp.float32)
    weight = jax.random.normal(kw, (C_out, C_in, 1, 1), dtype=jnp.float32) * 0.1

    out = netlin_layer_forward(x, weight)
    out = jax.block_until_ready(out)

    # reference check (pure JAX 1x1 conv)
    ref = jnp.einsum("nchw,oc->nohw", x, weight.reshape(C_out, C_in))
    assert out.shape == (N, C_out, H, W)
    assert jnp.allclose(out, ref, atol=1e-4, rtol=1e-4)

    print("KERNEL_OK")
</pallas_src>

<mosaic_0001>
module attributes {stable_mosaic.version = 11 : i64} {
  func.func @_conv1x1_kernel(%arg0: i32, %arg1: i32, %arg2: memref<1x4x256xf32, #tpu.memory_space<vmem>>, %arg3: memref<1x4xf32, #tpu.memory_space<vmem>>, %arg4: memref<1x1x256xf32, #tpu.memory_space<vmem>>) attributes {dimension_semantics = [#tpu.dimension_semantics<parallel>, #tpu.dimension_semantics<parallel>], iteration_bounds = array<i64: 2, 1>, scalar_prefetch = 0 : i64, scratch_operands = 0 : i64, tpu.core_type = #tpu.core_type<tc>, window_params = [{transform_indices = @transform_0, window_bounds = array<i64: 1, 4, 256>}, {pipeline_mode = #tpu.pipeline_mode<synchronous>, transform_indices = @transform_1, window_bounds = array<i64: 1, 4>}, {transform_indices = @transform_2, window_bounds = array<i64: 1, 1, 256>}]} {
    %c0 = arith.constant 0 : index
    %c0_0 = arith.constant 0 : index
    %0 = vector.load %arg3[%c0, %c0_0] : memref<1x4xf32, #tpu.memory_space<vmem>>, vector<1x4xf32>
    %c0_1 = arith.constant 0 : index
    %c0_2 = arith.constant 0 : index
    %c0_3 = arith.constant 0 : index
    %1 = vector.load %arg2[%c0_1, %c0_2, %c0_3] : memref<1x4x256xf32, #tpu.memory_space<vmem>>, vector<1x4x256xf32>
    %2 = vector.shape_cast %1 : vector<1x4x256xf32> to vector<4x256xf32>
    %cst = arith.constant dense<0.000000e+00> : vector<1x256xf32>
    %3 = tpu.matmul %0, %2, %cst {dimension_numbers = #tpu.dot_dimension_numbers<[1], [0], [0], [1], [0, 0, 1, 1], [], []>} : vector<1x4xf32>, vector<4x256xf32>, vector<1x256xf32> -> vector<1x256xf32>
    %c0_4 = arith.constant 0 : index
    %c0_5 = arith.constant 0 : index
    %c0_6 = arith.constant 0 : index
    %4 = vector.load %arg4[%c0_4, %c0_5, %c0_6] : memref<1x1x256xf32, #tpu.memory_space<vmem>>, vector<1x1x256xf32>
    %5 = vector.shape_cast %4 : vector<1x1x256xf32> to vector<1x256xf32>
    %6 = vector.shape_cast %3 : vector<1x256xf32> to vector<1x1x256xf32>
    tpu.vector_store %arg4[%c0_4, %c0_5, %c0_6], %6 {strides = array<i32>} : memref<1x1x256xf32, #tpu.memory_space<vmem>>, vector<1x1x256xf32>,
    return
  }
  func.func @transform_0(%arg0: i32, %arg1: i32) -> (i32, i32, i32) {
    %c0_i32 = arith.constant 0 : i32
    %c0_i32_0 = arith.constant 0 : i32
    return %arg0, %c0_i32, %arg1 : i32, i32, i32
  }
  func.func @transform_1(%arg0: i32, %arg1: i32) -> (i32, i32) {
    %c0_i32 = arith.constant 0 : i32
    %c0_i32_0 = arith.constant 0 : i32
    %c0_i32_1 = arith.constant 0 : i32
    return %c0_i32, %c0_i32_0 : i32, i32
  }
  func.func @transform_2(%arg0: i32, %arg1: i32) -> (i32, i32, i32) {
    %c0_i32 = arith.constant 0 : i32
    %c0_i32_0 = arith.constant 0 : i32
    return %arg0, %c0_i32, %arg1 : i32, i32, i32
  }
}

</mosaic_0001>

<bundles_post_ra>
// kernel: tpu_custom_call.1
= control target key start
LH: loop header
LB: loop body
LE: loop exit
PB: predicated region body
PF: predicated region fallthrough
CT: control target
= control target key end

     0   :  { %7 = vsyncpa [#allocation3], 0  ;;  %s782_s0 = inlined_call_operand.hbm [shape: f32[2,4,256], index: 0, kind: input, shape index: {}]   ;;  %s783_s1 = inlined_call_operand.hbm [shape: f32[1,4], index: 1, kind: input, shape index: {}]   ;;  %s784_s2 = inlined_call_operand.hbm [shape: f32[2,1,256], index: 2, kind: output, shape index: {}]  }
   0x1   :  { %9 = vsyncpa [#allocation3 + $0x1], 0 }
   0x2   :  { %10 = vsyncpa [#allocation6], 0 }
   0x3   :  { %11 = vsyncpa [#allocation4], 0 }
   0x4   :  { %13 = vsyncpa [#allocation4 + $0x1], 0  ;;  %s632_s9 = smov 0   ;;  %s634_s10 = smov 0  }
   0x5   :  { %s636_s11 = smov 0   ;;  %s638_s12 = smov 0  }
   0x6   :  { %s640_s13 = smov 0   ;;  %s642_s14 = smov 0  }
   0x7 LB: > { %s374_s15 = sadd.s32 4294967295, %s614_s14   ;;  %s375_s16 = sadd.s32 4294967294, %s614_s14   ;;  %s614_s14 = sphi %s642_s14, %s19_s14   ;;  %s610_s13 = sphi %s640_s13, %s796_s13   ;;  %s606_s12 = sphi %s638_s12, %s795_s12   ;;  %s602_s11 = sphi %s636_s11, %s794_s11   ;;  %s598_s10 = sphi %s634_s10, %s793_s10   ;;  %s594_s9 = sphi %s632_s9, %s792_s9  }
   0x8   : > { %p53_p0 = scmp.ne.s32.totalorder %s598_s10, %s594_s9  ;;  %p666_p1 = scmp.eq.s32.totalorder %s374_s15, 0 }
   0x9   : > { %p670_p2 = scmp.eq.s32.totalorder %s374_s15, 1  ;;  %p106_p3 = scmp.eq.s32.totalorder %s375_s16, 1 }
   0xa   : > { %p676_p4 = por %p666_p1, %p53_p0  ;;  %p376_p5 = scmp.ge.s32.totalorder %s614_s14, 1 }
   0xb   : > { %p681_p6 = por %p106_p3, %p53_p0  ;;  %p113_p7 = scmp.lt.s32.totalorder %s614_s14, 3 }
   0xc   : > { %s125_s23 = sshll.u32 %s783_s1, 4  ;;  %p378_p9 = scmp.ge.s32.totalorder %s614_s14, 2  ;;  %s126_s23 = int_to_ptr.hbm [resolvable:$true] %s125_s23 }
   0xd   : > { %p689_p8 = pnand %p376_p5, %p113_p7  ;;  %s616_s25 = smov [#allocation5]  }
   0xe   : > { %s127_s26 = sshll.u32 %s616_s25, 4  ;;  %s31_s27 = sadd.s32 1, %s610_s13  ;;  %s128_s26 = int_to_ptr.vmem [resolvable:$true] %s127_s26 }
   0xf   : > { %p403_p10 = pneg %p689_p8  ;;  %p33_p12 = scmp.ge.s32.totalorder %s31_s27, 2 }
  0x10   : > { %s40_s28 = sadd.s32 1, %s602_s11  ;;  %p47_p13 = scmp.ne.s32.totalorder %s602_s11, %s598_s10 }
  0x11   : > { %p404_p11 = pnand %p403_p10, %p666_p1  ;;  %p48_p0 = scmp.eq.s32.totalorder %s614_s14, 0 }
  0x12   : > { %s798_s27 = smov (%p33_p12, %s31_s27), 0  ;;  %p711_p5 = por %p670_p2, %p47_p13 }
  0x13   : > { %406 = dma.hbm_to_vmem [thread:$0]  (!%p404_p11), %s126_s23, 16, %s128_s26, [#allocation6]  }
  0x14   : > { %p705_p3 = por %p48_p0, %p47_p13  ;;  %s35_s3 = ssub.s32 %s610_s13, %s798_s27 }
  0x15   : > { %p416_p7 = scmp.lt.s32.totalorder %s614_s14, 2  ;;  %p38_p10 = scmp.eq.s32.totalorder %s35_s3, 0 }
  0x16   : > { %s138_s4 = sand.u32 1, %s602_s11   ;;  %s394_s7 = sshll.u32 %s610_s13, 3 }
  0x17   : > { %s379_s5 = sshll.u32 %s138_s4, 3  ;;  %s149_s16 = scalar_lea.hbm %s782_s0, %s394_s7 }
  0x18   : > { %s720_s6 = scalar_select %p38_p10, %s602_s11, %s40_s28  }
  0x19   : > { %s142_s21 = scalar_lea.vmem [#allocation2], %s379_s5  ;;  %s151_s18 = sshll.u32 %s149_s16, 4  ;;  %s152_s18 = int_to_ptr.hbm [resolvable:$true] %s151_s18 }
  0x1a   : > { %s153_s22 = sshll.u32 %s142_s21, 4  ;;  %p408_p2 = pnand %p416_p7, %p705_p3  ;;  %s154_s22 = int_to_ptr.vmem [resolvable:$true] %s153_s22 }
  0x1b   : > { %s139_s23 = scalar_lea.sflag [#allocation3], %s138_s4  ;;  %162 = sbr.rel (%p689_p8) target bundleno = 177 (0xb1), region = 28 }
  0x1c   : > { %410 = dma.hbm_to_vmem [thread:$0]  (!%p408_p2), %s152_s18, 128, %s154_s22, %s139_s23  }
  0x1d   : > { %s731_s25 = sand.u32 (!%p689_p8), 1, %s598_s10  }
  0x1e   : > { %s383_s26 = sshll.u32 (!%p689_p8), %s731_s25, 3  ;;  %s165_s28 = scalar_lea.sflag (!%p689_p8), [#allocation3], %s731_s25 }
  0x1f   : > { %s168_s3 = scalar_lea.vmem (!%p689_p8), [#allocation2], %s383_s26 }
  0x20   : > { %581 = dma.done.wait (%p676_p4), %s165_s28, 128  }
  0x21   : > { %583 = vsyncadd (%p676_p4), %s165_s28, 4294967168 }
  0x22   : > { %585 = dma.done.wait (%p666_p1), [#allocation6], 16  }
  0x23   : > { %587 = vsyncadd (%p666_p1), [#allocation6], 4294967280  ;;  %v198_v0 = vld [vmem:[%s168_s3] sm:$0xff]  ;;  %vm207_vm0 = vcmask 1043456   ;;  %v197_v1 = vld [vmem:[#allocation5] sm:$0x1]  ;;  %v258_v4 = vlaneseq }
  0x24   : > { %200 = vst [vmem:[#allocation1] ss:$2 sm:$0xff] %v198_v0  ;;  %vm203_vm1 = vcmask 31744   ;;  %s385_s19 = sshll.u32 %s731_s25, 1  ;;  %s391_s24 = sshll.u32 %s606_s12, 1  ;;  %vm255_vm2 = vcmask 1040384  }
  0x25   : > { %s276_s17 = scalar_lea.hbm %s784_s2, %s391_s24  ;;  %s194_s5 = scalar_lea.vmem [#allocation7], %s385_s19  ;;  %vm260_vm3 = vcmp.lt.s32.totalorder %v258_v4, 256 }
  0x26   : > { %s278_s7 = sshll.u32 %s194_s5, 4  ;;  %s280_s8 = sshll.u32 %s276_s17, 4  ;;  %s279_s7 = int_to_ptr.vmem [resolvable:$true] %s278_s7  ;;  %s281_s8 = int_to_ptr.hbm [resolvable:$true] %s280_s8 }
  0x27   : > { %s264_s15 = scalar_lea.sflag [#allocation4], %s731_s25  ;;  %s542_s12 = sshra.s32 %s281_s8, 4  ;;  %s543_s12 = int_to_ptr.hbm [resolvable:$true] %s542_s12 }
  0x28   : > { %s544_s16 = scalar_lea.hbm %s543_s12, 2  ;;  %s548_s18 = scalar_lea.hbm %s784_s2, 4 }
  0x29   : > { %p545_p1 = scmp.ne.s32.totalorder %s543_s12, %s544_s16  ;;  %p549_p11 = scmp.lt.s32.totalorder %s543_s12, %s784_s2 }
  0x2a   : > { %p550_p12 = scmp.lt.s32.totalorder %s548_s18, %s544_s16 }
  0x2b   : > { %v202_v2 = vld.sshfl [vmem:[#allocation1 + $0x8] sm:$0xff pattern:$0x75316420]  ;;  %v201_v3 = vld.sshfl [vmem:[#allocation1] sm:$0xff pattern:$0x75316420]  ;;  %p546_p4 = pnand %p545_p1, %p711_p5 }
  0x2c   : > { %388 = vmatpush.msk.msra.mxu1 %vm207_vm0, %v202_v2  ;;  %386 = vmatpush.msk.msra.mxu0 %vm207_vm0, %v201_v3  ;;  %p551_p13 = por %p550_p12, %p549_p11 }
  0x2d   : > { %389 = vmatmul.msk.f32.vlgmr.msra.gmra.mxu1 %vm203_vm1, %v197_v1  ;;  %387 = vmatmul.msk.f32.vlgmr.msra.gmra.mxu0 %vm203_vm1, %v197_v1  ;;  %p547_p8 = pneg %p546_p4 }
  0x2f   : > { %p552_p0 = pnand %p551_p13, %p547_p8 }
  0xaa   : > { %v249_v5 = vpop.f32.mrf.mxu1  ;;  %v229_v6 = vpop.f32.mrf.mxu0 }
  0xab   : > { %v254_v7 = vrot.slane %v249_v5, 7 }
  0xad   : > { %v256_v8 = vsel %vm255_vm2, %v229_v6, %v254_v7 }
  0xae   : > { %262 = vst.msk [vmem:[%s194_s5] sm:$0x3] %vm260_vm3, %v256_v8 }
  0xaf   : > { %555 = shalt.err (!%p552_p0)
}
  0xb0   : > { %401 = dma.vmem_to_hbm [thread:$0]  (%p711_p5), %s279_s7, 32, %s281_s8, %s264_s15  }
  0xb1 PF: > { %s292_s25 = sand.u32 1, %s594_s9   ;;  %p412_p3 = pnand %p378_p9, %p681_p6 }
  0xb2   : > { %s293_s28 = scalar_lea.sflag [#allocation4], %s292_s25 }
  0xb3   : > { %p413_p7 = pneg %p412_p3 }
  0xb5   : > { %589 = dma.done.wait (%p413_p7), %s293_s28, 32  }
  0xb6   : > { %591 = vsyncadd (%p413_p7), %s293_s28, 4294967264  ;;  %s19_s14 = sadd.s32 1, %s614_s14   ;;  %s792_s9 = smov %s598_s10 }
  0xb7   : > { %p16_p10 = scmp.ge.s32.totalorder %s19_s14, 4   ;;  %s793_s10 = smov %s602_s11 }
  0xb8   : > { %s794_s11 = smov %s720_s6  ;;  %s795_s12 = smov %s610_s13 }
  0xb9   : > { %s796_s13 = smov %s798_s27  ;;  %18 = sbr.rel (!%p16_p10) target bundleno = 7 (0x7), region = 77 }
  0xbe   :  { %299 = vsyncpa [#allocation3], 1 }
  0xbf   :  { %301 = vsyncpa [#allocation3 + $0x1], 1 }
  0xc0   :  { %302 = vsyncpa [#allocation6], 1 }
  0xc1   :  { %303 = vsyncpa [#allocation4], 1 }
  0xc2   :  { %305 = vsyncpa [#allocation4 + $0x1], 1 }

</bundles_post_ra>
